<compile_context>
chip_gen: v7x
topology: tpu7x:2x2x1
jax: 0.10.0
libtpu: 0.0.40
codegen_flags: <defaults>
</compile_context>

<pallas_src>
import jax
import jax.numpy as jnp
from jax import lax
from jax.experimental import pallas as pl
from jax.experimental.pallas import tpu as pltpu


_LN_EPS = 1e-5
_GATHER_CHUNK = 8          # rows per DMA chunk in the HBM-gather fallback
_ONEHOT_V_MAX = 4096       # max vocab for the one-hot MXU gather path


# ---------------------------------------------------------------------------
# Shared LayerNorm epilogue (f32 accumulation, affine, cast on store).
# ---------------------------------------------------------------------------
def _layernorm_store(x, gamma_ref, beta_ref, out_ref):
    d = x.shape[-1]
    inv_d = jnp.float32(1.0 / d)
    # Independent sum / sum-of-squares reductions (can dual-issue on the XLUs).
    sx = jnp.sum(x, axis=-1, keepdims=True)
    sxx = jnp.sum(x * x, axis=-1, keepdims=True)
    mean = sx * inv_d
    var = jnp.maximum(sxx * inv_d - mean * mean, 0.0)   # guard cancellation -> no NaN
    xhat = (x - mean) * lax.rsqrt(var + _LN_EPS)        # rsqrt on the idle EUP slot
    out_ref[...] = (xhat * gamma_ref[...] + beta_ref[...]).astype(out_ref.dtype)


# ---------------------------------------------------------------------------
# Path 1: token table resident in VMEM, gather = one-hot matmul on the MXU.
# ---------------------------------------------------------------------------
def _resident_kernel(ids_ref, pos_ref, tok_ref, gamma_ref, beta_ref, out_ref):
    # ids_ref   : (TS, 1)  int32   token ids for this (seq-tile, batch) block
    # pos_ref   : (TS, D)  f32     positional + segment additive table tile
    # tok_ref   : (V, D)   native  token table (constant block index => resident)
    # gamma_ref : (1, D)   f32     LayerNorm scale
    # beta_ref  : (1, D)   f32     LayerNorm shift
    # out_ref   : (TS, D)
    TS, _ = out_ref.shape
    V = tok_ref.shape[0]

    tok = tok_ref[...]
    if tok.dtype not in (jnp.float32, jnp.bfloat16):
        tok = tok.astype(jnp.float32)
    onehot = (ids_ref[...] ==
              lax.broadcasted_iota(jnp.int32, (TS, V), 1)).astype(tok.dtype)
    # Exact row gather on the (otherwise idle) MXU with f32 accumulation.
    x = jnp.dot(onehot, tok, preferred_element_type=jnp.float32) + pos_ref[...]
    _layernorm_store(x, gamma_ref, beta_ref, out_ref)


# ---------------------------------------------------------------------------
# Path 2 (large-vocab fallback): table in HBM, chunked per-row DMA gather.
# ---------------------------------------------------------------------------
def _make_hbm_gather_kernel(TS):
    n_chunks = -(-TS // _GATHER_CHUNK)

    def kernel(ids_ref, pos_ref, tok_hbm, gamma_ref, beta_ref, out_ref,
               gbuf, sems):
        # ids_ref : (1, TS) int32 in SMEM (per-tile block -> bounded SMEM use)
        # tok_hbm : (V, D)  native dtype, left in HBM (pl.ANY)
        # gbuf    : (TS, D) native dtype VMEM gather buffer
        # sems    : (2, _GATHER_CHUNK) DMA semaphores (reusable chunk pool)

        def issue(c):
            buf = c % 2
            lo = c * _GATHER_CHUNK
            descs = []
            for j in range(min(_GATHER_CHUNK, TS - lo)):
                r = lo + j
                tok_id = ids_ref[0, r]            # scalar read from SMEM
                cp = pltpu.make_async_copy(
                    tok_hbm.at[pl.ds(tok_id, 1), :],
                    gbuf.at[pl.ds(r, 1), :],
                    sems.at[buf, j])
                cp.start()
                descs.append(cp)
            return descs

        # Chunked, software-pipelined gather: issue chunk c+1 (all SMEM scalar
        # reads + DMA starts) BEFORE waiting on chunk c, and keep the original
        # descriptors for the waits.
        pending = issue(0)
        for c in range(1, n_chunks):
            nxt = issue(c)
            for cp in pending:
                cp.wait()
            pending = nxt
        for cp in pending:
            cp.wait()

        # TODO(synk): double-buffer the gather across grid steps
        # (gbuf -> (2, TS, D)) to also hide the first chunk's latency behind the
        # previous tile's LayerNorm + writeback.
        x = gbuf[...].astype(jnp.float32) + pos_ref[...]
        _layernorm_store(x, gamma_ref, beta_ref, out_ref)

    return kernel


# ---------------------------------------------------------------------------
# Wrapper
# ---------------------------------------------------------------------------
def _vmem_capacity_bytes():
    try:
        info = pltpu.get_tpu_info()
        cap = getattr(info, "vmem_capacity_bytes", None)
        if cap:
            return int(cap)
    except Exception:
        pass
    return 64 * 1024 * 1024   # conservative default (v7x per-TC VMEM)


def _pick_seq_tile(S, per_row_bytes, budget_bytes):
    for ts in (512, 256, 128, 64, 32, 16, 8):
        if ts <= S and S % ts == 0 and ts * per_row_bytes <= budget_bytes:
            return ts
    return S   # full-extent block is always legal


def _pos_segment_table(S, D, seg_table):
    # Sinusoidal PE and the segment embedding both depend only on the position,
    # so fold them into a single (S, D) additive table outside the kernel
    # (zero EUP work in the kernel; segment table never enters the kernel).
    pos = jnp.arange(S, dtype=jnp.float32)[:, None]
    dexp = 2.0 * jnp.arange(D, dtype=jnp.float32) / jnp.float32(D)
    ang = pos / (10000.0 ** dexp)
    pe = jnp.where((jnp.arange(D) % 2) == 0, jnp.sin(ang), jnp.cos(ang))
    seg_ids = jnp.zeros((S,), jnp.int32).at[S // 2 + 1:].set(1)
    return (pe + seg_table[seg_ids].astype(jnp.float32)).astype(jnp.float32)


def joint_embedding_layer(ids, tok_table, seg_table, gamma, beta, *,
                          out_dtype=jnp.float32, force_hbm_gather=False):
    B, S = ids.shape
    V, D = tok_table.shape
    tok_el = jnp.dtype(tok_table.dtype).itemsize
    out_el = jnp.dtype(out_dtype).itemsize
    table_bytes = V * D * tok_el

    vmem_cap = _vmem_capacity_bytes()
    resident_budget = vmem_cap // 4
    use_resident = ((not force_hbm_gather) and V <= _ONEHOT_V_MAX
                    and 2 * table_bytes <= resident_budget)

    pos_seg = _pos_segment_table(S, D, seg_table)
    gamma2d = gamma.reshape(1, D).astype(jnp.float32)
    beta2d = beta.reshape(1, D).astype(jnp.float32)
    # One vectorized clamp in the wrapper (note: diverges from nn.Embedding,
    # which would raise on out-of-range ids).
    ids = jnp.clip(ids.astype(jnp.int32), 0, V - 1)

    # Per-row VMEM bytes of a (TS, D) tile: pos (f32 x2 bufs) + out (x2) + temps.
    per_row = D * (4 * 2 + out_el * 2 + 4 * 3)
    if use_resident:
        per_row += 4 * V                      # one-hot row
        tile_budget = max(vmem_cap // 4, vmem_cap // 2 - 2 * table_bytes)
    else:
        per_row += D * tok_el                 # gather-buffer row
        tile_budget = vmem_cap // 3
    TS = _pick_seq_tile(S, per_row, tile_budget)

    vmem_limit = int(min(
        vmem_cap,
        max(32 << 20,
            (2 * table_bytes if use_resident else 0) + 2 * TS * per_row + (8 << 20))))
    cparams = pltpu.CompilerParams(
        dimension_semantics=("parallel", "parallel"),
        vmem_limit_bytes=vmem_limit)

    # Grid: sequence OUTER, batch INNER so the pos/segment tile (and resident
    # table / gamma / beta) keep a constant block index across the inner batch
    # iterations and are not re-fetched from HBM.
    grid = (S // TS, B)
    out_shape = jax.ShapeDtypeStruct((B, S, D), out_dtype)
    out_spec = pl.BlockSpec((None, TS, D), lambda s, b: (b, s, 0))
    pos_spec = pl.BlockSpec((TS, D), lambda s, b: (s, 0))
    affine_spec = pl.BlockSpec((1, D), lambda s, b: (0, 0))

    if use_resident:
        ids3d = ids.reshape(B, S, 1)
        return pl.pallas_call(
            _resident_kernel,
            out_shape=out_shape,
            grid=grid,
            in_specs=[
                pl.BlockSpec((None, TS, 1), lambda s, b: (b, s, 0)),   # ids
                pos_spec,                                              # pos+seg
                pl.BlockSpec((V, D), lambda s, b: (0, 0)),             # resident table
                affine_spec,                                           # gamma
                affine_spec,                                           # beta
            ],
            out_specs=out_spec,
            compiler_params=cparams,
        )(ids3d, pos_seg, tok_table, gamma2d, beta2d)

    # Large-vocab fallback: table stays in HBM, chunked per-row DMA gather.
    kernel = _make_hbm_gather_kernel(TS)
    return pl.pallas_call(
        kernel,
        out_shape=out_shape,
        grid=grid,
        in_specs=[
            pl.BlockSpec((1, TS), lambda s, b: (b, s),
                         memory_space=pltpu.MemorySpace.SMEM),         # ids (per tile)
            pos_spec,                                                  # pos+seg
            pl.BlockSpec(memory_space=pl.ANY),                         # table in HBM
            affine_spec,                                               # gamma
            affine_spec,                                               # beta
        ],
        out_specs=out_spec,
        scratch_shapes=[
            pltpu.VMEM((TS, D), tok_table.dtype),                      # gather buffer
            pltpu.SemaphoreType.DMA((2, _GATHER_CHUNK)),               # chunk sem pool
        ],
        compiler_params=cparams,
    )(ids, pos_seg, tok_table, gamma2d, beta2d)


# ---------------------------------------------------------------------------
# Pure-JAX reference mirroring the PyTorch module semantics.
# ---------------------------------------------------------------------------
def reference_forward(ids, tok_table, seg_table, gamma, beta):
    B, S = ids.shape
    D = tok_table.shape[1]
    seg_ids = jnp.zeros_like(ids).at[:, S // 2 + 1:].set(1)
    pos = jnp.arange(S, dtype=jnp.float32)[:, None]
    d = 2.0 * jnp.arange(D, dtype=jnp.float32) / D
    ang = pos / (10000.0 ** d)
    pe = jnp.where(jnp.arange(D) % 2 == 0, jnp.sin(ang), jnp.cos(ang))   # (S, D)
    x = tok_table[ids].astype(jnp.float32) + seg_table[seg_ids] + pe[None]
    mean = x.mean(-1, keepdims=True)
    var = ((x - mean) ** 2).mean(-1, keepdims=True)
    xhat = (x - mean) / jnp.sqrt(var + _LN_EPS)
    return xhat * gamma.reshape(1, 1, D) + beta.reshape(1, 1, D)


if __name__ == "__main__":
    VOCAB = 64
    SIZE = 128      # hidden dim (lane-friendly)
    B, S = 2, 16

    key = jax.random.PRNGKey(0)
    k_tok, k_seg, k_g, k_b, k_ids = jax.random.split(key, 5)

    tok_table = jax.random.normal(k_tok, (VOCAB, SIZE), dtype=jnp.float32)
    seg_table = jax.random.normal(k_seg, (VOCAB, SIZE), dtype=jnp.float32)
    gamma = 1.0 + 0.1 * jax.random.normal(k_g, (SIZE,), dtype=jnp.float32)
    beta = 0.1 * jax.random.normal(k_b, (SIZE,), dtype=jnp.float32)
    ids = jax.random.randint(k_ids, (B, S), 0, VOCAB, dtype=jnp.int32)

    # f32 token table, native dtype passed straight through.
    out = jax.block_until_ready(
        joint_embedding_layer(ids, tok_table, seg_table, gamma, beta))
    ref = reference_forward(ids, tok_table, seg_table, gamma, beta)
    assert out.shape == (B, S, SIZE)
    assert jnp.allclose(out, ref, atol=1e-4, rtol=1e-4), "f32 mismatch vs reference"

    # Native bf16 token table (no f32 materialization in the wrapper, upcast in-kernel).
    tok_bf16 = tok_table.astype(jnp.bfloat16)
    out_bf = jax.block_until_ready(
        joint_embedding_layer(ids, tok_bf16, seg_table, gamma, beta))
    ref_bf = reference_forward(ids, tok_bf16.astype(jnp.float32), seg_table, gamma, beta)
    assert jnp.allclose(out_bf, ref_bf, atol=2e-2, rtol=2e-2), "bf16 mismatch vs reference"

    print("KERNEL_OK")
</pallas_src>

<mosaic_0001>
module attributes {stable_mosaic.version = 11 : i64} {
  func.func @_resident_kernel(%arg0: i32, %arg1: i32, %arg2: memref<1x16x1xi32, #tpu.memory_space<vmem>>, %arg3: memref<16x128xf32, #tpu.memory_space<vmem>>, %arg4: memref<64x128xf32, #tpu.memory_space<vmem>>, %arg5: memref<1x128xf32, #tpu.memory_space<vmem>>, %arg6: memref<1x128xf32, #tpu.memory_space<vmem>>, %arg7: memref<1x16x128xf32, #tpu.memory_space<vmem>>) attributes {dimension_semantics = [#tpu.dimension_semantics<parallel>, #tpu.dimension_semantics<parallel>], iteration_bounds = array<i64: 1, 2>, scalar_prefetch = 0 : i64, scratch_operands = 0 : i64, tpu.core_type = #tpu.core_type<tc>, window_params = [{transform_indices = @transform_0, window_bounds = array<i64: 1, 16, 1>}, {transform_indices = @transform_1, window_bounds = array<i64: 16, 128>}, {pipeline_mode = #tpu.pipeline_mode<synchronous>, transform_indices = @transform_2, window_bounds = array<i64: 64, 128>}, {pipeline_mode = #tpu.pipeline_mode<synchronous>, transform_indices = @transform_3, window_bounds = array<i64: 1, 128>}, {pipeline_mode = #tpu.pipeline_mode<synchronous>, transform_indices = @transform_4, window_bounds = array<i64: 1, 128>}, {transform_indices = @transform_5, window_bounds = array<i64: 1, 16, 128>}]} {
    %c0 = arith.constant 0 : index
    %c0_0 = arith.constant 0 : index
    %0 = vector.load %arg4[%c0, %c0_0] : memref<64x128xf32, #tpu.memory_space<vmem>>, vector<64x128xf32>
    %c0_1 = arith.constant 0 : index
    %c0_2 = arith.constant 0 : index
    %c0_3 = arith.constant 0 : index
    %1 = vector.load %arg2[%c0_1, %c0_2, %c0_3] : memref<1x16x1xi32, #tpu.memory_space<vmem>>, vector<1x16x1xi32>
    %2 = vector.shape_cast %1 : vector<1x16x1xi32> to vector<16x1xi32>
    %3 = tpu.iota {dimensions = array<i32: 1>} : vector<16x64xi32>
    %4 = vector.broadcast %2 : vector<16x1xi32> to vector<16x64xi32>
    %5 = arith.cmpi eq, %4, %3 : vector<16x64xi32>
    %6 = arith.extui %5 : vector<16x64xi1> to vector<16x64xi32>
    %7 = arith.sitofp %6 : vector<16x64xi32> to vector<16x64xf32>
    %cst = arith.constant dense<0.000000e+00> : vector<16x128xf32>
    %8 = tpu.matmul %7, %0, %cst {dimension_numbers = #tpu.dot_dimension_numbers<[1], [0], [0], [1], [0, 0, 1, 1], [], []>} : vector<16x64xf32>, vector<64x128xf32>, vector<16x128xf32> -> vector<16x128xf32>
    %c0_4 = arith.constant 0 : index
    %c0_5 = arith.constant 0 : index
    %9 = vector.load %arg3[%c0_4, %c0_5] : memref<16x128xf32, #tpu.memory_space<vmem>>, vector<16x128xf32>
    %10 = arith.addf %8, %9 : vector<16x128xf32>
    %cst_6 = arith.constant dense<0.000000e+00> : vector<16xf32>
    %11 = vector.multi_reduction <add>, %10, %cst_6 [1] : vector<16x128xf32> to vector<16xf32>
    %12 = vector.shape_cast %11 : vector<16xf32> to vector<16x1xf32>
    %13 = arith.mulf %10, %10 : vector<16x128xf32>
    %cst_7 = arith.constant dense<0.000000e+00> : vector<16xf32>
    %14 = vector.multi_reduction <add>, %13, %cst_7 [1] : vector<16x128xf32> to vector<16xf32>
    %15 = vector.shape_cast %14 : vector<16xf32> to vector<16x1xf32>
    %cst_8 = arith.constant 7.812500e-03 : f32
    %16 = vector.broadcast %cst_8 : f32 to vector<16x1xf32>
    %17 = arith.mulf %12, %16 : vector<16x1xf32>
    %cst_9 = arith.constant 7.812500e-03 : f32
    %18 = vector.broadcast %cst_9 : f32 to vector<16x1xf32>
    %19 = arith.mulf %15, %18 : vector<16x1xf32>
    %20 = arith.mulf %17, %17 : vector<16x1xf32>
    %21 = arith.subf %19, %20 : vector<16x1xf32>
    %cst_10 = arith.constant 0.000000e+00 : f32
    %22 = vector.broadcast %cst_10 : f32 to vector<16x1xf32>
    %23 = arith.maximumf %21, %22 : vector<16x1xf32>
    %24 = vector.broadcast %17 : vector<16x1xf32> to vector<16x128xf32>
    %25 = arith.subf %10, %24 : vector<16x128xf32>
    %cst_11 = arith.constant 9.99999974E-6 : f32
    %26 = vector.broadcast %cst_11 : f32 to vector<16x1xf32>
    %27 = arith.addf %23, %26 : vector<16x1xf32>
    %28 = math.rsqrt %27 : vector<16x1xf32>
    %29 = vector.broadcast %28 : vector<16x1xf32> to vector<16x128xf32>
    %30 = arith.mulf %25, %29 : vector<16x128xf32>
    %c0_12 = arith.constant 0 : index
    %c0_13 = arith.constant 0 : index
    %31 = vector.load %arg5[%c0_12, %c0_13] : memref<1x128xf32, #tpu.memory_space<vmem>>, vector<1x128xf32>
    %32 = vector.broadcast %31 : vector<1x128xf32> to vector<16x128xf32>
    %33 = arith.mulf %30, %32 : vector<16x128xf32>
    %c0_14 = arith.constant 0 : index
    %c0_15 = arith.constant 0 : index
    %34 = vector.load %arg6[%c0_14, %c0_15] : memref<1x128xf32, #tpu.memory_space<vmem>>, vector<1x128xf32>
    %35 = vector.broadcast %34 : vector<1x128xf32> to vector<16x128xf32>
    %36 = arith.addf %33, %35 : vector<16x128xf32>
    %c0_16 = arith.constant 0 : index
    %c0_17 = arith.constant 0 : index
    %c0_18 = arith.constant 0 : index
    %37 = vector.load %arg7[%c0_16, %c0_17, %c0_18] : memref<1x16x128xf32, #tpu.memory_space<vmem>>, vector<1x16x128xf32>
    %38 = vector.shape_cast %37 : vector<1x16x128xf32> to vector<16x128xf32>
    %39 = vector.shape_cast %36 : vector<16x128xf32> to vector<1x16x128xf32>
    tpu.vector_store %arg7[%c0_16, %c0_17, %c0_18], %39 {strides = array<i32>} : memref<1x16x128xf32, #tpu.memory_space<vmem>>, vector<1x16x128xf32>,
    return
  }
  func.func @transform_0(%arg0: i32, %arg1: i32) -> (i32, i32, i32) {
    %c0_i32 = arith.constant 0 : i32
    %c0_i32_0 = arith.constant 0 : i32
    return %arg1, %arg0, %c0_i32 : i32, i32, i32
  }
  func.func @transform_1(%arg0: i32, %arg1: i32) -> (i32, i32) {
    %c0_i32 = arith.constant 0 : i32
    %c0_i32_0 = arith.constant 0 : i32
    return %arg0, %c0_i32 : i32, i32
  }
  func.func @transform_2(%arg0: i32, %arg1: i32) -> (i32, i32) {
    %c0_i32 = arith.constant 0 : i32
    %c0_i32_0 = arith.constant 0 : i32
    %c0_i32_1 = arith.constant 0 : i32
    return %c0_i32, %c0_i32_0 : i32, i32
  }
  func.func @transform_3(%arg0: i32, %arg1: i32) -> (i32, i32) {
    %c0_i32 = arith.constant 0 : i32
    %c0_i32_0 = arith.constant 0 : i32
    %c0_i32_1 = arith.constant 0 : i32
    return %c0_i32, %c0_i32_0 : i32, i32
  }
  func.func @transform_4(%arg0: i32, %arg1: i32) -> (i32, i32) {
    %c0_i32 = arith.constant 0 : i32
    %c0_i32_0 = arith.constant 0 : i32
    %c0_i32_1 = arith.constant 0 : i32
    return %c0_i32, %c0_i32_0 : i32, i32
  }
  func.func @transform_5(%arg0: i32, %arg1: i32) -> (i32, i32, i32) {
    %c0_i32 = arith.constant 0 : i32
    %c0_i32_0 = arith.constant 0 : i32
    return %arg1, %arg0, %c0_i32 : i32, i32, i32
  }
}

</mosaic_0001>

<bundles_post_ra>
// kernel: tpu_custom_call.1
= control target key start
LH: loop header
LB: loop body
LE: loop exit
PB: predicated region body
PF: predicated region fallthrough
CT: control target
= control target key end

     0   :  { %10 = vsyncpa [#allocation3], 0  ;;  %s1030_s0 = inlined_call_operand.vmem [shape: s32[2,16,1], index: 0, kind: input, shape index: {}]   ;;  %s1031_s1 = inlined_call_operand.vmem [shape: f32[16,128], index: 1, kind: input, shape index: {}]   ;;  %s1032_s2 = inlined_call_operand.hbm [shape: f32[64,128], index: 2, kind: input, shape index: {}]   ;;  %s1033_s3 = inlined_call_operand.vmem [shape: f32[1,128], index: 3, kind: input, shape index: {}]   ;;  %s1034_s4 = inlined_call_operand.vmem [shape: f32[1,128], index: 4, kind: input, shape index: {}]   ;;  %s1035_s5 = inlined_call_operand.hbm [shape: f32[2,16,128], index: 5, kind: output, shape index: {}]  }
   0x1   :  { %11 = vsyncpa [#allocation4], 0 }
   0x2   :  { %13 = vsyncpa [#allocation4 + $0x1], 0  ;;  %s865_s18 = smov 0   ;;  %s867_s19 = smov 0  }
   0x3   :  { %s869_s20 = smov 0   ;;  %s871_s21 = smov 0  }
   0x4   :  { %s873_s22 = smov 0   ;;  %s875_s23 = smov 0  }
   0x5 LB: > { %s569_s24 = sadd.s32 4294967295, %s825_s23   ;;  %s570_s25 = sadd.s32 4294967294, %s825_s23   ;;  %s825_s23 = sphi %s875_s23, %s19_s23   ;;  %s821_s22 = sphi %s873_s22, %s1053_s22   ;;  %s817_s21 = sphi %s871_s21, %s1052_s21   ;;  %s813_s20 = sphi %s869_s20, %s1051_s20   ;;  %s809_s19 = sphi %s867_s19, %s1050_s19   ;;  %s805_s18 = sphi %s865_s18, %s1049_s18  }
   0x6   : > { %s28_s26 = sadd.s32 1, %s821_s22  ;;  %s157_s27 = sadd.s32 1, %s813_s20 }
   0x7   : > { %p29_p0 = scmp.ge.s32.totalorder %s28_s26, 2  ;;  %p167_p1 = scmp.ne.s32.totalorder %s813_s20, %s809_s19 }
   0x8   : > { %p168_p2 = scmp.eq.s32.totalorder %s569_s24, 1  ;;  %p173_p3 = scmp.ne.s32.totalorder %s809_s19, %s805_s18 }
   0x9   : > { %s1055_s26 = smov (%p29_p0, %s28_s26), 0  ;;  %p174_p5 = scmp.eq.s32.totalorder %s570_s25, 1 }
   0xa   : > { %p905_p4 = por %p168_p2, %p167_p1  ;;  %s152_s29 = ssub.s32 %s821_s22, %s1055_s26 }
   0xb   : > { %p571_p6 = scmp.ge.s32.totalorder %s825_s23, 1  ;;  %p155_p7 = scmp.eq.s32.totalorder %s152_s29, 0 }
   0xc   : > { %s1040_s28 = scalar_select %p905_p4, 1, 0 }
   0xd   : > { %p912_p8 = por %p174_p5, %p173_p3  ;;  %p181_p9 = scmp.lt.s32.totalorder %s825_s23, 3 }
   0xe   : > { %s918_s6 = scalar_select %p155_p7, %s813_s20, %s157_s27  }
   0xf   : > { %s1041_s30 = scalar_select %p912_p8, 1, 0 }
  0x10   : > { %p920_p10 = pnand %p571_p6, %p181_p9  ;;  %p924_p11 = scmp.eq.s32.totalorder %s569_s24, 0 }
  0x11   : > { %s827_s9 = smov [#allocation2]   ;;  %s715_s14 = scalar_lea.hbm %s1032_s2, 1024 }
  0x12   : > { %s1042_s7 = scalar_select %p920_p10, 1, 0 }
  0x13   : > { %s1043_s8 = scalar_select %p924_p11, 1, 0 }
  0x14   : > { %p644_p12 = pneg %p920_p10  ;;  %s202_s10 = sshll.u32 %s827_s9, 4  ;;  %s203_s10 = int_to_ptr.vmem [resolvable:$true] %s202_s10 }
  0x15   : > { %p716_p0 = scmp.ne.s32.totalorder %s1032_s2, %s715_s14  ;;  %p722_p5 = scmp.lt.u32.totalorder %s715_s14, %s1032_s2 }
  0x16   : > { %p932_p13 = pnand %p924_p11, %p644_p12 }
  0x18   : > { %p717_p1 = pneg %p932_p13 }
  0x1a   : > { %p718_p2 = pnand %p717_p1, %p716_p0 }
  0x1c   : > { %p719_p3 = pneg %p718_p2 }
  0x1e   : > { %p724_p6 = pnand %p722_p5, %p719_p3 }
  0x20   : > { %727 = shalt.err (!%p724_p6)
}
  0x21   : > { %s728_s25 = scalar_lea.vmem %s203_s10, 1024  ;;  %p736_p8 = scmp.lt.s32.totalorder %s203_s10, %s203_s10 }
  0x22   : > { %p729_p7 = scmp.ne.s32.totalorder %s203_s10, %s728_s25  ;;  %p737_p4 = scmp.lt.s32.totalorder %s728_s25, %s728_s25 }
  0x24   : > { %p731_p9 = pnand %p729_p7, %p717_p1  ;;  %p738_p11 = por %p737_p4, %p736_p8 }
  0x26   : > { %p732_p12 = pneg %p731_p9 }
  0x28   : > { %p739_p10 = pnand %p738_p11, %p732_p12 }
  0x2a   : > { %742 = shalt.err (!%p739_p10)
}
  0x2b   : > { %s828_s27 = smov 128   ;;  %s829_s29 = smov 8  }
  0x2c   : > { %647 = dma.hbm_to_vmem [thread:$0]  (!%p932_p13), %s1032_s2, 1024, %s203_s10, [#allocation3], %s828_s27, %s828_s27, %s829_s29  }
  0x2d   : > { %p1045_p0 = scmp.ne.s32.totalorder %s1042_s7, 0 }
  0x2e   : > { %p1046_p2 = scmp.ne.s32.totalorder (!%p1045_p0), %s1043_s8, 0 }
  0x2f   : > { %237 = sbr.rel (%p1045_p0) target bundleno = 600 (0x258), region = 40 }
  0x36   : > { %796 = dma.done.wait (%p1046_p2), [#allocation3], 1024  }
  0x37   : > { %798 = vsyncadd (%p1046_p2), [#allocation3], 4294966272  ;;  %p275_p4 = scmp.lt.s32.totalorder %s817_s21, 1  ;;  %v830_v0 = vmov 0   ;;  %v291_v2 = vld [vmem:[#allocation2] sm:$0xff]  ;;  %v292_v3 = vld [vmem:[#allocation2 + $0x8] sm:$0xff]  ;;  %v301_v15 = vlaneseq }
  0x38   : > { %710 = vset.pattern.permute.xlu0 %v830_v0  ;;  %v293_v4 = vld [vmem:[#allocation2 + $0x10] sm:$0xff]  ;;  %v294_v5 = vld [vmem:[#allocation2 + $0x18] sm:$0xff]  ;;  %v622_v7 = vpack.c.bf16 %v292_v3, %v291_v2  ;;  %v295_v9 = vld [vmem:[#allocation2 + $0x20] sm:$0xff]  ;;  %vm317_vm0 = vcmask 523264   ;;  %v831_v18 = vmov 0.0   ;;  %s271_s24 = sand.u32 1, %s809_s19  }
  0x39   : > { %s276_s13 = scalar_select %p275_p4, %s817_s21, 1  ;;  %v626_v8 = vpack.c.bf16 %v294_v5, %v293_v4  ;;  %v296_v10 = vld [vmem:[#allocation2 + $0x28] sm:$0xff]  ;;  %v297_v12 = vld [vmem:[#allocation2 + $0x30] sm:$0xff]  ;;  %v298_v13 = vld [vmem:[#allocation2 + $0x38] sm:$0xff]  ;;  %v302_v16 = vand.u32 127, %v301_v15 }
  0x3a   : > { %623 = vmatprep.subr.bf16.mxu0 %v622_v7  ;;  %v630_v11 = vpack.c.bf16 %v296_v10, %v295_v9  ;;  %v634_v14 = vpack.c.bf16 %v298_v13, %v297_v12  ;;  %v316_v22 = vld [vmem:[%s1031_s1 + $0x8] sm:$0xff]  ;;  %v315_v23 = vld [vmem:[%s1031_s1] sm:$0xff]  ;;  %s577_s25 = sshll.u32 %s271_s24, 4  ;;  %s984_s8 = scalar_lea.sflag [#allocation4], %s271_s24 }
  0x3b   : > { %s591_s11 = sshll.u32 %s276_s13, 4  ;;  %625 = vmatpush3.bf16.msra.mxu0 %v622_v7  ;;  %v584_v48 = vld [vmem:[%s1033_s3] ss:$0 sm:$0xff]  ;;  %s592_s13 = sshll.u32 %s817_s21, 8 }
  0x3c   : > { %s282_s10 = scalar_lea.vmem %s1030_s0, %s591_s11  ;;  %627 = vmatprep.subr.bf16.mxu0 %v626_v8  ;;  %v585_v52 = vld [vmem:[%s1034_s4] ss:$0 sm:$0xff]  ;;  %s273_s11 = scalar_lea.vmem [#allocation5], %s577_s25 }
  0x3d   : > { %v299_v1 = vld [vmem:[%s282_s10] sm:$0xff]  ;;  %v300_v6 = vld [vmem:[%s282_s10 + $0x8] sm:$0xff]  ;;  %s463_s14 = sshll.u32 %s273_s11, 4  ;;  %s980_s7 = scalar_lea.hbm %s1035_s5, %s592_s13  ;;  %s982_s14 = int_to_ptr.vmem [resolvable:$true] %s463_s14 }
  0x3e   : > { %304 = vperm.xlu0 %710, %v299_v1   ;;  %s743_s21 = scalar_lea.vmem %s982_s14, 256  ;;  %p1047_p10 = scmp.ne.s32.totalorder %s1040_s28, 0 }
  0x3f   : > { %629 = vmatpush3.bf16.msra.mxu0 %v626_v8  ;;  %p744_p8 = scmp.ne.s32.totalorder %s982_s14, %s743_s21  ;;  %s832_s16 = smov [#allocation5]  }
  0x40   : > { %631 = vmatprep.subr.bf16.mxu0 %v630_v11  ;;  %s747_s17 = sshll.u32 %s832_s16, 4  ;;  %s748_s17 = int_to_ptr.vmem [resolvable:$false] %s747_s17 }
  0x41   : > { %p745_p11 = pnand %p744_p8, %p1047_p10  ;;  %s749_s25 = scalar_lea.vmem %s748_s17, 512 }
  0x42   : > { %307 = vperm.xlu0 %710, %v300_v6   ;;  %p750_p1 = scmp.lt.s32.totalorder %s982_s14, %s748_s17  ;;  %p751_p3 = scmp.lt.s32.totalorder %s749_s25, %s743_s21 }
  0x43   : > { %633 = vmatpush3.bf16.msra.mxu0 %v630_v11  ;;  %p746_p13 = pneg %p745_p11 }
  0x44   : > { %635 = vmatprep.subr.bf16.mxu0 %v634_v14  ;;  %p752_p5 = por %p751_p3, %p750_p1 }
  0x46   : > { %p753_p6 = pnand %p752_p5, %p746_p13 }
  0x47   : > { %637 = vmatpush3.bf16.msra.mxu0 %v634_v14 }
  0xbd   : > { %v305_v17 = vpop.permute.xlu0 %304 }
  0xbe   : > { %vm309_vm1 = vcmp.eq.s32.totalorder %v305_v17, %v302_v16 }
  0xbf   : > { %v580_v19 = vsel %vm309_vm1, 1.0, %v831_v18 }
  0xc0   : > { %619 = vmatprep.mubr.msk.f32.mxu0 %vm317_vm0, %v580_v19 }
  0xc1   : > { %v308_v20 = vpop.permute.xlu0 %307 }
  0xc2   : > { %vm310_vm2 = vcmp.eq.s32.totalorder %v308_v20, %v302_v16 }
  0xc3   : > { %v581_v21 = vsel %vm310_vm2, 1.0, %v831_v18 }
  0xc4   : > { %620 = vmatmul.mubr.msk.f32.vlgmr.msra.gmra.mrb[0].mxu0 %vm317_vm0, %v581_v21 }
 0x197   : > { %v621_v24 = vpop.f32.mrb[0].mxu0 }
 0x198   : > { %v396_v25 = vadd.f32 %v621_v24, %v316_v22  ;;  %v390_v26 = vpop.f32.mrb[1].mxu0 }
 0x199   : > { %v391_v27 = vadd.f32 %v390_v26, %v315_v23 }
 0x19a   : > { %401 = vadd.xlane.f32.xlu1 %v396_v25  ;;  %v404_v29 = vmul.f32 %v396_v25, %v396_v25 }
 0x19b   : > { %v403_v28 = vmul.f32 %v391_v27, %v391_v27 }
 0x19d   : > { %405 = vadd.xlane.f32.xlu0 %v403_v28 }
 0x19e   : > { %399 = vadd.xlane.f32.xlu1 %v391_v27 }
 0x1a2   : > { %407 = vadd.xlane.f32.xlu1 %v404_v29 }
 0x227   : > { %v402_v30 = vpop.xlane.xlu1 %401 }
 0x228   : > { %v410_v33 = vmul.f32 0.0078125, %v402_v30 }
 0x22a   : > { %v406_v31 = vpop.xlane.xlu0 %405  ;;  %v414_v38 = vmul.f32 %v410_v33, %v410_v33  ;;  %v420_v49 = vsub.f32 %v396_v25, %v410_v33 }
 0x22b   : > { %v400_v32 = vpop.xlane.xlu1 %399  ;;  %v411_v35 = vmul.f32 0.0078125, %v406_v31 }
 0x22c   : > { %v409_v34 = vmul.f32 0.0078125, %v400_v32 }
 0x22e   : > { %v413_v36 = vmul.f32 %v409_v34, %v409_v34  ;;  %v419_v46 = vsub.f32 %v391_v27, %v409_v34 }
 0x22f   : > { %v408_v37 = vpop.xlane.xlu1 %407 }
 0x230   : > { %v415_v39 = vsub.f32 %v411_v35, %v413_v36  ;;  %v412_v40 = vmul.f32 0.0078125, %v408_v37 }
 0x232   : > { %v417_v41 = vmax.f32 %v415_v39, 0.0  ;;  %v416_v42 = vsub.f32 %v412_v40, %v414_v38 }
 0x234   : > { %v421_v43 = vadd.f32 1e-05, %v417_v41  ;;  %v418_v44 = vmax.f32 %v416_v42, 0.0 }
 0x236   : > { %711 = vrsqrt.f32 %v421_v43  ;;  %v422_v45 = vadd.f32 1e-05, %v418_v44 }
 0x238   : > { %713 = vrsqrt.f32 %v422_v45 }
 0x240   : > { %v712_v47 = vpop.eup %711 }
 0x241   : > { %v425_v50 = vmul.f32 %v712_v47, %v419_v46 }
 0x242   : > { %v714_v51 = vpop.eup %713 }
 0x243   : > { %v434_v53 = vmul.f32 %v584_v48, %v425_v50  ;;  %v426_v54 = vmul.f32 %v714_v51, %v420_v49 }
 0x245   : > { %v443_v55 = vadd.f32 %v585_v52, %v434_v53  ;;  %v435_v56 = vmul.f32 %v584_v48, %v426_v54 }
 0x247   : > { %445 = vst [vmem:[%s273_s11] sm:$0xff] %v443_v55  ;;  %v444_v57 = vadd.f32 %v585_v52, %v435_v56 }
 0x249   : > { %446 = vst [vmem:[%s273_s11 + $0x8] sm:$0xff] %v444_v57 }
 0x24a   : > { %756 = shalt.err (!%p753_p6)
}
 0x24b   : > { %s757_s24 = scalar_lea.hbm %s980_s7, 256  ;;  %s761_s9 = scalar_lea.hbm %s1035_s5, 512 }
 0x24c   : > { %p758_p7 = scmp.ne.s32.totalorder %s980_s7, %s757_s24  ;;  %p762_p0 = scmp.lt.u32.totalorder %s980_s7, %s1035_s5 }
 0x24d   : > { %p763_p2 = scmp.lt.u32.totalorder %s761_s9, %s757_s24  ;;  %p765_p8 = scmp.lt.u32.totalorder %s757_s24, %s980_s7 }
 0x24e   : > { %p759_p9 = pnand %p758_p7, %p1047_p10 }
 0x24f   : > { %p764_p4 = por %p763_p2, %p762_p0 }
 0x250   : > { %p760_p12 = pneg %p759_p9 }
 0x251   : > { %p766_p11 = por %p765_p8, %p764_p4 }
 0x253   : > { %p767_p13 = pnand %p766_p11, %p760_p12 }
 0x255   : > { %770 = shalt.err (!%p767_p13)
}
 0x256   : > { %s833_s11 = smov 128   ;;  %s834_s15 = smov 8  }
 0x257   : > { %642 = dma.vmem_to_hbm [thread:$0]  (%p1047_p10), %s982_s14, 256, %s980_s7, %s984_s8, %s833_s11, %s833_s11, %s834_s15  }
 0x258 PF: > { %p654_p1 = scmp.ge.s32.totalorder %s825_s23, 2  ;;  %s478_s10 = sand.u32 1, %s805_s18  }
 0x259   : > { %p1048_p3 = scmp.ne.s32.totalorder %s1041_s30, 0  ;;  %s479_s21 = scalar_lea.sflag [#allocation4], %s478_s10 }
 0x25b   : > { %p649_p5 = pnand %p654_p1, %p1048_p3 }
 0x25d   : > { %800 = dma.done.wait (!%p649_p5), %s479_s21, 256  }
 0x25e   : > { %802 = vsyncadd (!%p649_p5), %s479_s21, 4294967040  ;;  %s19_s23 = sadd.s32 1, %s825_s23   ;;  %s1049_s18 = smov %s809_s19 }
 0x25f   : > { %p16_p6 = scmp.ge.s32.totalorder %s19_s23, 4   ;;  %s1050_s19 = smov %s813_s20 }
 0x260   : > { %s1051_s20 = smov %s918_s6  ;;  %s1052_s21 = smov %s821_s22 }
 0x261   : > { %s1053_s22 = smov %s1055_s26  ;;  %18 = sbr.rel (!%p16_p6) target bundleno = 5 (0x5), region = 83 }
 0x268   :  { %484 = vsyncpa [#allocation3], 1 }
 0x269   :  { %486 = vsyncpa [#allocation3 + $0x1], 1 }
 0x26a   :  { %487 = vsyncpa [#allocation4], 1 }
 0x26b   :  { %489 = vsyncpa [#allocation4 + $0x1], 1 }

</bundles_post_ra>
